<compile_context>
chip_gen: v7x
topology: tpu7x:2x2x1
jax: 0.10.0
libtpu: 0.0.40
codegen_flags: <defaults>
</compile_context>

<pallas_src>
import functools

import jax
import jax.numpy as jnp
from jax.experimental import pallas as pl
from jax.experimental.pallas import tpu as pltpu

_HALF_LOG_2PI = 0.9189385332046727  # 0.5 * log(2*pi)
_EPS = 1e-10


def _lgamma_pos(z):
    """lgamma(z) for z > 0: Stirling series after a fixed shift of 7.

    EUP cost per call: 2 logs + 1 approx reciprocal (the reciprocal only feeds
    the small 1/(12s) - 1/(360 s^3) correction).  Absolute error < ~1e-6.
    # TODO(synk): the shift product grows like z**7 and overflows f32 for
    # z > ~3e5; split log(p) into two logs if such raw counts are expected.
    """
    s = z + 7.0
    p = (z * (z + 1.0)) * ((z + 2.0) * (z + 3.0)) * ((z + 4.0) * (z + 5.0)) * (z + 6.0)
    u = pl.reciprocal(s, approx=True)
    corr = u * (1.0 / 12.0) - (u * u * u) * (1.0 / 360.0)
    return (s - 0.5) * jnp.log(s) - s + _HALF_LOG_2PI + corr - jnp.log(p)


def _zinb_kernel(x_ref, mean_ref, disp_ref, pi_ref, sf_ref, out_ref, *,
                 ridge_lambda, batch, tile_rows, lane_chunks, row_groups,
                 mask_rows):
    # Cast per-tile inside the kernel (free VPU op) instead of wrapper astype.
    x = x_ref[...].astype(jnp.float32)
    disp = disp_ref[...].astype(jnp.float32)
    pi = pi_ref[...].astype(jnp.float32)
    mean = mean_ref[...].astype(jnp.float32) * sf_ref[...].astype(jnp.float32)

    # Shared transcendentals (EUP is the binding slot).
    log_disp = jnp.log(disp + _EPS)          # log(disp + eps)
    log_dpm = jnp.log(disp + mean + _EPS)    # log(disp + mean + eps)
    log_mean = jnp.log(mean + _EPS)          # log(mean + eps)

    t1 = (_lgamma_pos(disp + _EPS)
          + _lgamma_pos(x + 1.0)
          - _lgamma_pos(x + disp + _EPS))
    # (disp + x) * log(1 + mean/(disp+eps)) == (disp + x) * (log_dpm - log_disp)
    t2 = (disp + x) * (log_dpm - log_disp) + x * (log_disp - log_mean)
    nb_case = t1 + t2 - jnp.log(1.0 - pi + _EPS)

    # ((disp+eps)/(disp+mean+eps))**disp  -- well defined at disp == 0 (== 1).
    zero_nb = jnp.exp(disp * (log_disp - log_dpm))
    zero_case = -jnp.log(pi + (1.0 - pi) * zero_nb + _EPS)

    result = jnp.where(x <= 1e-8, zero_case, nb_case)
    if ridge_lambda > 0.0:
        result = result + ridge_lambda * jnp.square(pi)

    # (tb, G) -> (tb, 128): lane-tile-aligned slices, pure VPU adds.
    acc = result[:, 0:128]
    for c in range(1, lane_chunks):
        acc = acc + result[:, c * 128:(c + 1) * 128]

    # Zero out padded rows of a ragged final tile (garbage reads -> dropped).
    if mask_rows:
        row = (jax.lax.broadcasted_iota(jnp.int32, (tile_rows, 128), 0)
               + pl.program_id(0) * tile_rows)
        acc = jnp.where(row < batch, acc, 0.0)

    # (tb, 128) -> (8, 128): sublane-tile-aligned slices, pure VPU adds.
    part = acc[0:8, :]
    for r in range(1, row_groups):
        part = part + acc[r * 8:(r + 1) * 8, :]

    # Lane-dense, unmasked (8,128) store of this tile's partial sums.
    out_ref[...] = part


def zinb_loss(x, mean, disp, pi, scale_factor=1.0, ridge_lambda=0.0):
    """Pallas ZINB loss. x/mean/disp/pi: (B, G); scale_factor: scalar or (B,)."""
    B, G = x.shape
    assert G % 128 == 0, "G must be a multiple of 128 (lane-aligned blocks)"
    # TODO(synk): pad/mask the gene axis to support arbitrary G.

    sf = jnp.broadcast_to(jnp.asarray(scale_factor, jnp.float32).reshape(-1), (B,))
    sf = sf.reshape(B, 1)

    # Batch tile: big enough to amortize per-step overhead, small enough that
    # double-buffered inputs + elementwise temporaries stay well under v7x's
    # 64 MiB VMEM (tile bytes <= ~1 MiB => total footprint ~10-20 MiB).
    tb_cap = min(512, max(8, ((1 << 20) // (4 * G)) // 8 * 8))
    if B <= tb_cap:
        tb = max(8, ((B + 7) // 8) * 8)   # single tile, rounded to sublanes
    else:
        tb = tb_cap
    num_tiles = pl.cdiv(B, tb)
    mask_rows = (num_tiles * tb != B)

    elem_spec = pl.BlockSpec((tb, G), lambda i: (i, 0))
    sf_spec = pl.BlockSpec((tb, 1), lambda i: (i, 0))
    out_spec = pl.BlockSpec((8, 128), lambda i: (i, 0))   # per-tile partial

    kernel = functools.partial(
        _zinb_kernel,
        ridge_lambda=float(ridge_lambda),
        batch=B,
        tile_rows=tb,
        lane_chunks=G // 128,
        row_groups=tb // 8,
        mask_rows=mask_rows,
    )

    partials = pl.pallas_call(
        kernel,
        out_shape=jax.ShapeDtypeStruct((num_tiles * 8, 128), jnp.float32),
        grid_spec=pltpu.PrefetchScalarGridSpec(
            num_scalar_prefetch=0,
            grid=(num_tiles,),
            in_specs=[elem_spec, elem_spec, elem_spec, elem_spec, sf_spec],
            out_specs=out_spec,
        ),
        compiler_params=pltpu.CompilerParams(
            dimension_semantics=("parallel",),   # independent output blocks
            vmem_limit_bytes=32 << 20,           # explicit (v5e default = 16 MiB)
        ),
    )(x, mean, disp, pi, sf)

    # Tiny final reduction + mean in plain JAX (keeps the grid parallel).
    return jnp.sum(partials) / jnp.float32(B * G)


# Pure-JAX reference (mirrors the PyTorch module exactly) for validation.
def zinb_loss_ref(x, mean, disp, pi, scale_factor, ridge_lambda=0.0):
    eps = 1e-10
    sf = scale_factor[:, None]
    mean = mean * sf
    lg = jax.scipy.special.gammaln
    t1 = lg(disp + eps) + lg(x + 1.0) - lg(x + disp + eps)
    t2 = ((disp + x) * jnp.log(1.0 + mean / (disp + eps))
          + x * (jnp.log(disp + eps) - jnp.log(mean + eps)))
    nb_final = t1 + t2
    nb_case = nb_final - jnp.log(1.0 - pi + eps)
    zero_nb = jnp.power(disp / (disp + mean + eps), disp)
    zero_case = -jnp.log(pi + (1.0 - pi) * zero_nb + eps)
    result = jnp.where(x <= 1e-8, zero_case, nb_case)
    if ridge_lambda > 0:
        result = result + ridge_lambda * jnp.square(pi)
    return jnp.mean(result)


if __name__ == "__main__":
    key = jax.random.PRNGKey(0)
    kx, km, kd, kp, ks = jax.random.split(key, 5)

    B, G = 16, 256  # small, lane-aligned shapes

    # Count-like data with plenty of zeros (exercises the zero-inflation branch).
    x = jnp.floor(
        jax.random.exponential(kx, (B, G), dtype=jnp.float32) * 2.0
    ).astype(jnp.float32)
    mean = jnp.exp(0.5 * jax.random.normal(km, (B, G), dtype=jnp.float32)) + 0.1
    disp = jax.random.uniform(kd, (B, G), dtype=jnp.float32,
                              minval=0.5, maxval=2.0)
    pi = jax.nn.sigmoid(jax.random.normal(kp, (B, G), dtype=jnp.float32))
    scale_factor = jax.random.uniform(ks, (B,), dtype=jnp.float32,
                                      minval=0.5, maxval=1.5)

    out = zinb_loss(x, mean, disp, pi, scale_factor, ridge_lambda=0.1)
    out = jax.block_until_ready(out)

    ref = zinb_loss_ref(x, mean, disp, pi, scale_factor, ridge_lambda=0.1)
    ref = jax.block_until_ready(ref)

    assert jnp.isfinite(out), "kernel produced non-finite loss"
    assert jnp.allclose(out, ref, rtol=1e-4, atol=1e-4), (
        f"mismatch: pallas={out} ref={ref}")

    print("KERNEL_OK")
</pallas_src>

<mosaic_0001>
module attributes {stable_mosaic.version = 11 : i64} {
  func.func @_zinb_kernel(%arg0: i32, %arg1: memref<16x256xf32, #tpu.memory_space<vmem>>, %arg2: memref<16x256xf32, #tpu.memory_space<vmem>>, %arg3: memref<16x256xf32, #tpu.memory_space<vmem>>, %arg4: memref<16x256xf32, #tpu.memory_space<vmem>>, %arg5: memref<16x1xf32, #tpu.memory_space<vmem>>, %arg6: memref<8x128xf32, #tpu.memory_space<vmem>>) attributes {dimension_semantics = [#tpu.dimension_semantics<parallel>], iteration_bounds = array<i64: 1>, scalar_prefetch = 0 : i64, scratch_operands = 0 : i64, tpu.core_type = #tpu.core_type<tc>, window_params = [{transform_indices = @transform_0, window_bounds = array<i64: 16, 256>}, {transform_indices = @transform_1, window_bounds = array<i64: 16, 256>}, {transform_indices = @transform_2, window_bounds = array<i64: 16, 256>}, {transform_indices = @transform_3, window_bounds = array<i64: 16, 256>}, {transform_indices = @transform_4, window_bounds = array<i64: 16, 1>}, {transform_indices = @transform_5, window_bounds = array<i64: 8, 128>}]} {
    %c0 = arith.constant 0 : index
    %c0_0 = arith.constant 0 : index
    %0 = vector.load %arg1[%c0, %c0_0] : memref<16x256xf32, #tpu.memory_space<vmem>>, vector<16x256xf32>
    %c0_1 = arith.constant 0 : index
    %c0_2 = arith.constant 0 : index
    %1 = vector.load %arg3[%c0_1, %c0_2] : memref<16x256xf32, #tpu.memory_space<vmem>>, vector<16x256xf32>
    %c0_3 = arith.constant 0 : index
    %c0_4 = arith.constant 0 : index
    %2 = vector.load %arg4[%c0_3, %c0_4] : memref<16x256xf32, #tpu.memory_space<vmem>>, vector<16x256xf32>
    %c0_5 = arith.constant 0 : index
    %c0_6 = arith.constant 0 : index
    %3 = vector.load %arg2[%c0_5, %c0_6] : memref<16x256xf32, #tpu.memory_space<vmem>>, vector<16x256xf32>
    %c0_7 = arith.constant 0 : index
    %c0_8 = arith.constant 0 : index
    %4 = vector.load %arg5[%c0_7, %c0_8] : memref<16x1xf32, #tpu.memory_space<vmem>>, vector<16x1xf32>
    %5 = vector.broadcast %4 : vector<16x1xf32> to vector<16x256xf32>
    %6 = arith.mulf %3, %5 : vector<16x256xf32>
    %cst = arith.constant 1.000000e-10 : f32
    %7 = vector.broadcast %cst : f32 to vector<16x256xf32>
    %8 = arith.addf %1, %7 : vector<16x256xf32>
    %9 = math.log %8 : vector<16x256xf32>
    %10 = arith.addf %1, %6 : vector<16x256xf32>
    %cst_9 = arith.constant 1.000000e-10 : f32
    %11 = vector.broadcast %cst_9 : f32 to vector<16x256xf32>
    %12 = arith.addf %10, %11 : vector<16x256xf32>
    %13 = math.log %12 : vector<16x256xf32>
    %cst_10 = arith.constant 1.000000e-10 : f32
    %14 = vector.broadcast %cst_10 : f32 to vector<16x256xf32>
    %15 = arith.addf %6, %14 : vector<16x256xf32>
    %16 = math.log %15 : vector<16x256xf32>
    %cst_11 = arith.constant 1.000000e-10 : f32
    %17 = vector.broadcast %cst_11 : f32 to vector<16x256xf32>
    %18 = arith.addf %1, %17 : vector<16x256xf32>
    %cst_12 = arith.constant 7.000000e+00 : f32
    %19 = vector.broadcast %cst_12 : f32 to vector<16x256xf32>
    %20 = arith.addf %18, %19 : vector<16x256xf32>
    %cst_13 = arith.constant 1.000000e+00 : f32
    %21 = vector.broadcast %cst_13 : f32 to vector<16x256xf32>
    %22 = arith.addf %18, %21 : vector<16x256xf32>
    %23 = arith.mulf %18, %22 : vector<16x256xf32>
    %cst_14 = arith.constant 2.000000e+00 : f32
    %24 = vector.broadcast %cst_14 : f32 to vector<16x256xf32>
    %25 = arith.addf %18, %24 : vector<16x256xf32>
    %cst_15 = arith.constant 3.000000e+00 : f32
    %26 = vector.broadcast %cst_15 : f32 to vector<16x256xf32>
    %27 = arith.addf %18, %26 : vector<16x256xf32>
    %28 = arith.mulf %25, %27 : vector<16x256xf32>
    %29 = arith.mulf %23, %28 : vector<16x256xf32>
    %cst_16 = arith.constant 4.000000e+00 : f32
    %30 = vector.broadcast %cst_16 : f32 to vector<16x256xf32>
    %31 = arith.addf %18, %30 : vector<16x256xf32>
    %cst_17 = arith.constant 5.000000e+00 : f32
    %32 = vector.broadcast %cst_17 : f32 to vector<16x256xf32>
    %33 = arith.addf %18, %32 : vector<16x256xf32>
    %34 = arith.mulf %31, %33 : vector<16x256xf32>
    %35 = arith.mulf %29, %34 : vector<16x256xf32>
    %cst_18 = arith.constant 6.000000e+00 : f32
    %36 = vector.broadcast %cst_18 : f32 to vector<16x256xf32>
    %37 = arith.addf %18, %36 : vector<16x256xf32>
    %38 = arith.mulf %35, %37 : vector<16x256xf32>
    %39 = tpu.reciprocal %20 {approx = true} : vector<16x256xf32> -> vector<16x256xf32>
    %cst_19 = arith.constant 0.0833333358 : f32
    %40 = vector.broadcast %cst_19 : f32 to vector<16x256xf32>
    %41 = arith.mulf %39, %40 : vector<16x256xf32>
    %42 = arith.mulf %39, %39 : vector<16x256xf32>
    %43 = arith.mulf %42, %39 : vector<16x256xf32>
    %cst_20 = arith.constant 0.00277777785 : f32
    %44 = vector.broadcast %cst_20 : f32 to vector<16x256xf32>
    %45 = arith.mulf %43, %44 : vector<16x256xf32>
    %46 = arith.subf %41, %45 : vector<16x256xf32>
    %cst_21 = arith.constant 5.000000e-01 : f32
    %47 = vector.broadcast %cst_21 : f32 to vector<16x256xf32>
    %48 = arith.subf %20, %47 : vector<16x256xf32>
    %49 = math.log %20 : vector<16x256xf32>
    %50 = arith.mulf %48, %49 : vector<16x256xf32>
    %51 = arith.subf %50, %20 : vector<16x256xf32>
    %cst_22 = arith.constant 0.918938517 : f32
    %52 = vector.broadcast %cst_22 : f32 to vector<16x256xf32>
    %53 = arith.addf %51, %52 : vector<16x256xf32>
    %54 = arith.addf %53, %46 : vector<16x256xf32>
    %55 = math.log %38 : vector<16x256xf32>
    %56 = arith.subf %54, %55 : vector<16x256xf32>
    %cst_23 = arith.constant 1.000000e+00 : f32
    %57 = vector.broadcast %cst_23 : f32 to vector<16x256xf32>
    %58 = arith.addf %0, %57 : vector<16x256xf32>
    %cst_24 = arith.constant 7.000000e+00 : f32
    %59 = vector.broadcast %cst_24 : f32 to vector<16x256xf32>
    %60 = arith.addf %58, %59 : vector<16x256xf32>
    %cst_25 = arith.constant 1.000000e+00 : f32
    %61 = vector.broadcast %cst_25 : f32 to vector<16x256xf32>
    %62 = arith.addf %58, %61 : vector<16x256xf32>
    %63 = arith.mulf %58, %62 : vector<16x256xf32>
    %cst_26 = arith.constant 2.000000e+00 : f32
    %64 = vector.broadcast %cst_26 : f32 to vector<16x256xf32>
    %65 = arith.addf %58, %64 : vector<16x256xf32>
    %cst_27 = arith.constant 3.000000e+00 : f32
    %66 = vector.broadcast %cst_27 : f32 to vector<16x256xf32>
    %67 = arith.addf %58, %66 : vector<16x256xf32>
    %68 = arith.mulf %65, %67 : vector<16x256xf32>
    %69 = arith.mulf %63, %68 : vector<16x256xf32>
    %cst_28 = arith.constant 4.000000e+00 : f32
    %70 = vector.broadcast %cst_28 : f32 to vector<16x256xf32>
    %71 = arith.addf %58, %70 : vector<16x256xf32>
    %cst_29 = arith.constant 5.000000e+00 : f32
    %72 = vector.broadcast %cst_29 : f32 to vector<16x256xf32>
    %73 = arith.addf %58, %72 : vector<16x256xf32>
    %74 = arith.mulf %71, %73 : vector<16x256xf32>
    %75 = arith.mulf %69, %74 : vector<16x256xf32>
    %cst_30 = arith.constant 6.000000e+00 : f32
    %76 = vector.broadcast %cst_30 : f32 to vector<16x256xf32>
    %77 = arith.addf %58, %76 : vector<16x256xf32>
    %78 = arith.mulf %75, %77 : vector<16x256xf32>
    %79 = tpu.reciprocal %60 {approx = true} : vector<16x256xf32> -> vector<16x256xf32>
    %cst_31 = arith.constant 0.0833333358 : f32
    %80 = vector.broadcast %cst_31 : f32 to vector<16x256xf32>
    %81 = arith.mulf %79, %80 : vector<16x256xf32>
    %82 = arith.mulf %79, %79 : vector<16x256xf32>
    %83 = arith.mulf %82, %79 : vector<16x256xf32>
    %cst_32 = arith.constant 0.00277777785 : f32
    %84 = vector.broadcast %cst_32 : f32 to vector<16x256xf32>
    %85 = arith.mulf %83, %84 : vector<16x256xf32>
    %86 = arith.subf %81, %85 : vector<16x256xf32>
    %cst_33 = arith.constant 5.000000e-01 : f32
    %87 = vector.broadcast %cst_33 : f32 to vector<16x256xf32>
    %88 = arith.subf %60, %87 : vector<16x256xf32>
    %89 = math.log %60 : vector<16x256xf32>
    %90 = arith.mulf %88, %89 : vector<16x256xf32>
    %91 = arith.subf %90, %60 : vector<16x256xf32>
    %cst_34 = arith.constant 0.918938517 : f32
    %92 = vector.broadcast %cst_34 : f32 to vector<16x256xf32>
    %93 = arith.addf %91, %92 : vector<16x256xf32>
    %94 = arith.addf %93, %86 : vector<16x256xf32>
    %95 = math.log %78 : vector<16x256xf32>
    %96 = arith.subf %94, %95 : vector<16x256xf32>
    %97 = arith.addf %56, %96 : vector<16x256xf32>
    %98 = arith.addf %0, %1 : vector<16x256xf32>
    %cst_35 = arith.constant 1.000000e-10 : f32
    %99 = vector.broadcast %cst_35 : f32 to vector<16x256xf32>
    %100 = arith.addf %98, %99 : vector<16x256xf32>
    %cst_36 = arith.constant 7.000000e+00 : f32
    %101 = vector.broadcast %cst_36 : f32 to vector<16x256xf32>
    %102 = arith.addf %100, %101 : vector<16x256xf32>
    %cst_37 = arith.constant 1.000000e+00 : f32
    %103 = vector.broadcast %cst_37 : f32 to vector<16x256xf32>
    %104 = arith.addf %100, %103 : vector<16x256xf32>
    %105 = arith.mulf %100, %104 : vector<16x256xf32>
    %cst_38 = arith.constant 2.000000e+00 : f32
    %106 = vector.broadcast %cst_38 : f32 to vector<16x256xf32>
    %107 = arith.addf %100, %106 : vector<16x256xf32>
    %cst_39 = arith.constant 3.000000e+00 : f32
    %108 = vector.broadcast %cst_39 : f32 to vector<16x256xf32>
    %109 = arith.addf %100, %108 : vector<16x256xf32>
    %110 = arith.mulf %107, %109 : vector<16x256xf32>
    %111 = arith.mulf %105, %110 : vector<16x256xf32>
    %cst_40 = arith.constant 4.000000e+00 : f32
    %112 = vector.broadcast %cst_40 : f32 to vector<16x256xf32>
    %113 = arith.addf %100, %112 : vector<16x256xf32>
    %cst_41 = arith.constant 5.000000e+00 : f32
    %114 = vector.broadcast %cst_41 : f32 to vector<16x256xf32>
    %115 = arith.addf %100, %114 : vector<16x256xf32>
    %116 = arith.mulf %113, %115 : vector<16x256xf32>
    %117 = arith.mulf %111, %116 : vector<16x256xf32>
    %cst_42 = arith.constant 6.000000e+00 : f32
    %118 = vector.broadcast %cst_42 : f32 to vector<16x256xf32>
    %119 = arith.addf %100, %118 : vector<16x256xf32>
    %120 = arith.mulf %117, %119 : vector<16x256xf32>
    %121 = tpu.reciprocal %102 {approx = true} : vector<16x256xf32> -> vector<16x256xf32>
    %cst_43 = arith.constant 0.0833333358 : f32
    %122 = vector.broadcast %cst_43 : f32 to vector<16x256xf32>
    %123 = arith.mulf %121, %122 : vector<16x256xf32>
    %124 = arith.mulf %121, %121 : vector<16x256xf32>
    %125 = arith.mulf %124, %121 : vector<16x256xf32>
    %cst_44 = arith.constant 0.00277777785 : f32
    %126 = vector.broadcast %cst_44 : f32 to vector<16x256xf32>
    %127 = arith.mulf %125, %126 : vector<16x256xf32>
    %128 = arith.subf %123, %127 : vector<16x256xf32>
    %cst_45 = arith.constant 5.000000e-01 : f32
    %129 = vector.broadcast %cst_45 : f32 to vector<16x256xf32>
    %130 = arith.subf %102, %129 : vector<16x256xf32>
    %131 = math.log %102 : vector<16x256xf32>
    %132 = arith.mulf %130, %131 : vector<16x256xf32>
    %133 = arith.subf %132, %102 : vector<16x256xf32>
    %cst_46 = arith.constant 0.918938517 : f32
    %134 = vector.broadcast %cst_46 : f32 to vector<16x256xf32>
    %135 = arith.addf %133, %134 : vector<16x256xf32>
    %136 = arith.addf %135, %128 : vector<16x256xf32>
    %137 = math.log %120 : vector<16x256xf32>
    %138 = arith.subf %136, %137 : vector<16x256xf32>
    %139 = arith.subf %97, %138 : vector<16x256xf32>
    %140 = arith.addf %1, %0 : vector<16x256xf32>
    %141 = arith.subf %13, %9 : vector<16x256xf32>
    %142 = arith.mulf %140, %141 : vector<16x256xf32>
    %143 = arith.subf %9, %16 : vector<16x256xf32>
    %144 = arith.mulf %0, %143 : vector<16x256xf32>
    %145 = arith.addf %142, %144 : vector<16x256xf32>
    %146 = arith.addf %139, %145 : vector<16x256xf32>
    %cst_47 = arith.constant 1.000000e+00 : f32
    %147 = vector.broadcast %cst_47 : f32 to vector<16x256xf32>
    %148 = arith.subf %147, %2 : vector<16x256xf32>
    %cst_48 = arith.constant 1.000000e-10 : f32
    %149 = vector.broadcast %cst_48 : f32 to vector<16x256xf32>
    %150 = arith.addf %148, %149 : vector<16x256xf32>
    %151 = math.log %150 : vector<16x256xf32>
    %152 = arith.subf %146, %151 : vector<16x256xf32>
    %153 = arith.subf %9, %13 : vector<16x256xf32>
    %154 = arith.mulf %1, %153 : vector<16x256xf32>
    %155 = math.exp %154 : vector<16x256xf32>
    %cst_49 = arith.constant 1.000000e+00 : f32
    %156 = vector.broadcast %cst_49 : f32 to vector<16x256xf32>
    %157 = arith.subf %156, %2 : vector<16x256xf32>
    %158 = arith.mulf %157, %155 : vector<16x256xf32>
    %159 = arith.addf %2, %158 : vector<16x256xf32>
    %cst_50 = arith.constant 1.000000e-10 : f32
    %160 = vector.broadcast %cst_50 : f32 to vector<16x256xf32>
    %161 = arith.addf %159, %160 : vector<16x256xf32>
    %162 = math.log %161 : vector<16x256xf32>
    %cst_51 = arith.constant 0.000000e+00 : f32
    %163 = vector.broadcast %cst_51 : f32 to vector<16x256xf32>
    %164 = arith.subf %163, %162 : vector<16x256xf32>
    %cst_52 = arith.constant 9.99999993E-9 : f32
    %165 = vector.broadcast %cst_52 : f32 to vector<16x256xf32>
    %166 = arith.cmpf ole, %0, %165 : vector<16x256xf32>
    %167 = arith.select %166, %164, %152 : vector<16x256xi1>, vector<16x256xf32>
    %168 = arith.mulf %2, %2 : vector<16x256xf32>
    %cst_53 = arith.constant 1.000000e-01 : f32
    %169 = vector.broadcast %cst_53 : f32 to vector<16x256xf32>
    %170 = arith.mulf %169, %168 : vector<16x256xf32>
    %171 = arith.addf %167, %170 : vector<16x256xf32>
    %172 = vector.extract_strided_slice %171 {offsets = [0, 0], sizes = [16, 128], strides = [1, 1]} : vector<16x256xf32> to vector<16x128xf32>
    %173 = vector.extract_strided_slice %171 {offsets = [0, 128], sizes = [16, 128], strides = [1, 1]} : vector<16x256xf32> to vector<16x128xf32>
    %174 = arith.addf %172, %173 : vector<16x128xf32>
    %175 = vector.extract_strided_slice %174 {offsets = [0, 0], sizes = [8, 128], strides = [1, 1]} : vector<16x128xf32> to vector<8x128xf32>
    %176 = vector.extract_strided_slice %174 {offsets = [8, 0], sizes = [8, 128], strides = [1, 1]} : vector<16x128xf32> to vector<8x128xf32>
    %177 = arith.addf %175, %176 : vector<8x128xf32>
    %c0_54 = arith.constant 0 : index
    %c0_55 = arith.constant 0 : index
    %178 = vector.load %arg6[%c0_54, %c0_55] : memref<8x128xf32, #tpu.memory_space<vmem>>, vector<8x128xf32>
    tpu.vector_store %arg6[%c0_54, %c0_55], %177 {strides = array<i32>} : memref<8x128xf32, #tpu.memory_space<vmem>>, vector<8x128xf32>,
    return
  }
  func.func @transform_0(%arg0: i32) -> (i32, i32) {
    %c0_i32 = arith.constant 0 : i32
    %c0_i32_0 = arith.constant 0 : i32
    return %arg0, %c0_i32 : i32, i32
  }
  func.func @transform_1(%arg0: i32) -> (i32, i32) {
    %c0_i32 = arith.constant 0 : i32
    %c0_i32_0 = arith.constant 0 : i32
    return %arg0, %c0_i32 : i32, i32
  }
  func.func @transform_2(%arg0: i32) -> (i32, i32) {
    %c0_i32 = arith.constant 0 : i32
    %c0_i32_0 = arith.constant 0 : i32
    return %arg0, %c0_i32 : i32, i32
  }
  func.func @transform_3(%arg0: i32) -> (i32, i32) {
    %c0_i32 = arith.constant 0 : i32
    %c0_i32_0 = arith.constant 0 : i32
    return %arg0, %c0_i32 : i32, i32
  }
  func.func @transform_4(%arg0: i32) -> (i32, i32) {
    %c0_i32 = arith.constant 0 : i32
    %c0_i32_0 = arith.constant 0 : i32
    return %arg0, %c0_i32 : i32, i32
  }
  func.func @transform_5(%arg0: i32) -> (i32, i32) {
    %c0_i32 = arith.constant 0 : i32
    %c0_i32_0 = arith.constant 0 : i32
    return %arg0, %c0_i32 : i32, i32
  }
}

</mosaic_0001>

<bundles_post_ra>
// kernel: tpu_custom_call.1
= control target key start
LH: loop header
LB: loop body
LE: loop exit
PB: predicated region body
PF: predicated region fallthrough
CT: control target
= control target key end

     0   :  { %10 = vsyncpa [#allocation3], 0  ;;  %s1538_s0 = inlined_call_operand.hbm [shape: f32[16,256], index: 0, kind: input, shape index: {}]   ;;  %s1539_s1 = inlined_call_operand.hbm [shape: f32[16,256], index: 1, kind: input, shape index: {}]   ;;  %s1540_s2 = inlined_call_operand.hbm [shape: f32[16,256], index: 2, kind: input, shape index: {}]   ;;  %s1541_s3 = inlined_call_operand.hbm [shape: f32[16,256], index: 3, kind: input, shape index: {}]   ;;  %s1542_s4 = inlined_call_operand.vmem [shape: f32[16,1], index: 4, kind: input, shape index: {}]   ;;  %s1543_s5 = inlined_call_operand.hbm [shape: f32[8,128], index: 5, kind: output, shape index: {}]  }
   0x1   :  { %11 = vsyncpa [#allocation6], 0 }
   0x2   :  { %12 = vsyncpa [#allocation9], 0 }
   0x3   :  { %13 = vsyncpa [#allocation4], 0  ;;  %s901_s18 = smov [#allocation5]   ;;  %s902_s20 = smov [#allocation2]  }
   0x4   :  { %s31_s19 = sshll.u32 %s901_s18, 4  ;;  %s19_s21 = sshll.u32 %s902_s20, 4  ;;  %s32_s19 = int_to_ptr.vmem [resolvable:$true] %s31_s19  ;;  %s939_s21 = int_to_ptr.vmem [resolvable:$true] %s19_s21 }
   0x5   :  { %s783_s24 = scalar_lea.hbm %s1539_s1, 512 }
   0x6   :  { %p784_p0 = scmp.ne.s32.totalorder %s1539_s1, %s783_s24  ;;  %p787_p1 = scmp.lt.u32.totalorder %s783_s24, %s1539_s1 }
   0x8   :  { %p789_p2 = pnand %p787_p1, %p784_p0 }
   0xa   :  { %792 = shalt.err (!%p789_p2)
}
   0xb   :  { %s793_s29 = scalar_lea.vmem %s32_s19, 512  ;;  %p798_p4 = scmp.lt.s32.totalorder %s32_s19, %s32_s19 }
   0xc   :  { %p794_p3 = scmp.ne.s32.totalorder %s32_s19, %s793_s29  ;;  %p799_p5 = scmp.lt.s32.totalorder %s793_s29, %s793_s29 }
   0xe   :  { %p800_p6 = por %p799_p5, %p798_p4 }
  0x10   :  { %p801_p7 = pnand %p800_p6, %p794_p3 }
  0x12   :  { %804 = shalt.err (!%p801_p7)
}
  0x13   :  { %s903_s30 = smov 256   ;;  %s904_s6 = smov 16  }
  0x14   :  { %37 = dma.hbm_to_vmem [thread:$0]  %s1539_s1, 512, %s32_s19, [#allocation6], %s903_s30, %s903_s30, %s904_s6  }
  0x15   :  { %s805_s11 = scalar_lea.hbm %s1538_s0, 512 }
  0x16   :  { %p806_p8 = scmp.ne.s32.totalorder %s1538_s0, %s805_s11  ;;  %p809_p9 = scmp.lt.u32.totalorder %s805_s11, %s1538_s0 }
  0x18   :  { %p811_p10 = pnand %p809_p9, %p806_p8 }
  0x1a   :  { %814 = shalt.err (!%p811_p10)
}
  0x1b   :  { %s815_s16 = scalar_lea.vmem %s939_s21, 512  ;;  %p820_p12 = scmp.lt.s32.totalorder %s939_s21, %s939_s21 }
  0x1c   :  { %p816_p11 = scmp.ne.s32.totalorder %s939_s21, %s815_s16  ;;  %p821_p13 = scmp.lt.s32.totalorder %s815_s16, %s815_s16 }
  0x1e   :  { %p822_p0 = por %p821_p13, %p820_p12 }
  0x20   :  { %p823_p1 = pnand %p822_p0, %p816_p11 }
  0x22   :  { %826 = shalt.err (!%p823_p1)
}
  0x23   :  { %25 = dma.hbm_to_vmem [thread:$0]  %s1538_s0, 512, %s939_s21, [#allocation3], %s903_s30, %s903_s30, %s904_s6  }
  0x24   :  { %s905_s18 = smov [#allocation7]   ;;  %s906_s20 = smov [#allocation8]  }
  0x25   :  { %s43_s19 = sshll.u32 %s905_s18, 4  ;;  %s55_s22 = sshll.u32 %s906_s20, 4  ;;  %s44_s19 = int_to_ptr.vmem [resolvable:$true] %s43_s19  ;;  %s976_s22 = int_to_ptr.vmem [resolvable:$true] %s55_s22 }
  0x26   :  { %s827_s25 = scalar_lea.hbm %s1540_s2, 512 }
  0x27   :  { %p828_p2 = scmp.ne.s32.totalorder %s1540_s2, %s827_s25  ;;  %p831_p3 = scmp.lt.u32.totalorder %s827_s25, %s1540_s2 }
  0x29   :  { %p833_p4 = pnand %p831_p3, %p828_p2 }
  0x2b   :  { %836 = shalt.err (!%p833_p4)
}
  0x2c   :  { %s837_s0 = scalar_lea.vmem %s44_s19, 512  ;;  %p842_p6 = scmp.lt.s32.totalorder %s44_s19, %s44_s19 }
  0x2d   :  { %p838_p5 = scmp.ne.s32.totalorder %s44_s19, %s837_s0  ;;  %p843_p7 = scmp.lt.s32.totalorder %s837_s0, %s837_s0 }
  0x2f   :  { %p844_p8 = por %p843_p7, %p842_p6 }
  0x31   :  { %p845_p9 = pnand %p844_p8, %p838_p5 }
  0x33   :  { %848 = shalt.err (!%p845_p9)
}
  0x34   :  { %49 = dma.hbm_to_vmem [thread:$0]  %s1540_s2, 512, %s44_s19, [#allocation6], %s903_s30, %s903_s30, %s904_s6  }
  0x35   :  { %s849_s10 = scalar_lea.hbm %s1541_s3, 512 }
  0x36   :  { %p850_p10 = scmp.ne.s32.totalorder %s1541_s3, %s849_s10  ;;  %p853_p11 = scmp.lt.u32.totalorder %s849_s10, %s1541_s3 }
  0x38   :  { %p855_p12 = pnand %p853_p11, %p850_p10 }
  0x3a   :  { %858 = shalt.err (!%p855_p12)
}
  0x3b   :  { %s859_s15 = scalar_lea.vmem %s976_s22, 512  ;;  %p864_p0 = scmp.lt.s32.totalorder %s976_s22, %s976_s22 }
  0x3c   :  { %p860_p13 = scmp.ne.s32.totalorder %s976_s22, %s859_s15  ;;  %p865_p1 = scmp.lt.s32.totalorder %s859_s15, %s859_s15 }
  0x3e   :  { %p866_p2 = por %p865_p1, %p864_p0 }
  0x40   :  { %p867_p3 = pnand %p866_p2, %p860_p13 }
  0x42   :  { %870 = shalt.err (!%p867_p3)
}
  0x43   :  { %61 = dma.hbm_to_vmem [thread:$0]  %s1541_s3, 512, %s976_s22, [#allocation9], %s903_s30, %s903_s30, %s904_s6  }
  0x44   :  { %893 = dma.done.wait [#allocation3], 512  }
  0x45   :  { %894 = vsyncadd [#allocation3], 4294966784 }
  0x46   :  { %895 = dma.done.wait [#allocation6], 1024  }
  0x47   :  { %896 = vsyncadd [#allocation6], 4294966272 }
  0x48   :  { %897 = dma.done.wait [#allocation9], 512  }
  0x49   :  { %898 = vsyncadd [#allocation9], 4294966784  ;;  %v907_v0 = vmov 0   ;;  %v92_v1 = vld [vmem:[%s1542_s4] sm:$0xff]  ;;  %v93_v2 = vld [vmem:[%s1542_s4 + $0x8] sm:$0xff]  ;;  %s908_s3 = smov [#allocation10]  }
  0x4a   :  { %661 = vset.pattern.permute.xlu0 %v907_v0  ;;  %v1019_v3 = vld [vmem:[#allocation7] sm:$0xff]  ;;  %v1021_v4 = vld [vmem:[#allocation7 + $0x8] sm:$0xff]  ;;  %v1023_v5 = vld [vmem:[#allocation7 + $0x10] sm:$0xff]  ;;  %s630_s4 = sshll.u32 %s908_s3, 4  ;;  %s631_s4 = int_to_ptr.vmem [resolvable:$true] %s630_s4 }
  0x4b   :  { %96 = vperm.xlu0 %661, %v92_v1   ;;  %1567 = vst [vmem:[#allocation15_spill] sm:$0xff] %v1019_v3  ;;  %1568 = vst [vmem:[#allocation16_spill] sm:$0xff] %v1021_v4  ;;  %v1025_v6 = vld [vmem:[#allocation7 + $0x18] sm:$0xff]  ;;  %v108_v7 = vadd.f32 1e-10, %v1019_v3  ;;  %v1068_v44 = vld [vmem:[#allocation2] sm:$0xff]  ;;  %p876_p5 = scmp.lt.s32.totalorder %s631_s4, %s631_s4 }
  0x4c   :  { %1569 = vst [vmem:[#allocation17_spill] sm:$0xff] %v1023_v5  ;;  %1570 = vst [vmem:[#allocation18_spill] sm:$0xff] %v1025_v6  ;;  %v1029_v8 = vadd.f32 1e-10, %v1021_v4  ;;  %v1032_v9 = vadd.f32 1e-10, %v1023_v5 }
  0x4d   :  { %v1035_v10 = vadd.f32 1e-10, %v1025_v6  ;;  %662 = vlog2.f32 %v108_v7  ;;  %v1037_v11 = vadd.f32 7.0, %v108_v7  ;;  %v152_v12 = vadd.f32 1.0, %v108_v7  ;;  %1571 = vst [vmem:[#allocation19_spill] sm:$0xff] %v1068_v44  ;;  %v1071_v48 = vld [vmem:[#allocation2 + $0x8] sm:$0xff] }
  0x4e   :  { %v153_v13 = vadd.f32 1.0, %v1029_v8  ;;  %v154_v14 = vadd.f32 1.0, %v1032_v9  ;;  %v160_v15 = vadd.f32 2.0, %v108_v7  ;;  %v161_v16 = vadd.f32 2.0, %v1029_v8  ;;  %1572 = vst [vmem:[#allocation20_spill] sm:$0xff] %v1071_v48  ;;  %v1079_v56 = vld [vmem:[#allocation2 + $0x10] sm:$0xff] }
  0x4f   :  { %101 = vperm.xlu0 %661, %v93_v2   ;;  %v164_v17 = vadd.f32 3.0, %v108_v7  ;;  %v165_v18 = vadd.f32 3.0, %v1029_v8  ;;  %664 = vlog2.f32 %v1029_v8  ;;  %v1045_v19 = vadd.f32 7.0, %v1029_v8  ;;  %1573 = vst [vmem:[#allocation21_spill] sm:$0xff] %v1079_v56  ;;  %v1085_v60 = vld [vmem:[#allocation2 + $0x18] sm:$0xff]  ;;  %s871_s30 = scalar_lea.vmem %s631_s4, 128 }
  0x50   :  { %v162_v20 = vadd.f32 2.0, %v1032_v9  ;;  %v166_v21 = vadd.f32 3.0, %v1032_v9  ;;  %v1050_v22 = vadd.f32 7.0, %v1032_v9  ;;  %v155_v23 = vadd.f32 1.0, %v1035_v10  ;;  %1574 = vst [vmem:[#allocation22_spill] sm:$0xff] %v1085_v60  ;;  %p872_p4 = scmp.ne.s32.totalorder %s631_s4, %s871_s30  ;;  %p877_p6 = scmp.lt.s32.totalorder %s871_s30, %s871_s30 }
  0x51   :  { %v163_v24 = vadd.f32 2.0, %v1035_v10  ;;  %v167_v25 = vadd.f32 3.0, %v1035_v10  ;;  %v156_v26 = vmul.f32 %v152_v12, %v108_v7  ;;  %v157_v27 = vmul.f32 %v153_v13, %v1029_v8 }
  0x52   :  { %v158_v28 = vmul.f32 %v154_v14, %v1032_v9  ;;  %v176_v29 = vadd.f32 4.0, %v108_v7  ;;  %v168_v30 = vmul.f32 %v164_v17, %v160_v15  ;;  %v169_v31 = vmul.f32 %v165_v18, %v161_v16  ;;  %p878_p7 = por %p877_p6, %p876_p5 }
  0x53   :  { %v177_v32 = vadd.f32 4.0, %v1029_v8  ;;  %v180_v33 = vadd.f32 5.0, %v108_v7  ;;  %v170_v34 = vmul.f32 %v166_v21, %v162_v20  ;;  %v178_v35 = vadd.f32 4.0, %v1032_v9 }
  0x54   :  { %v181_v36 = vadd.f32 5.0, %v1029_v8  ;;  %v182_v37 = vadd.f32 5.0, %v1032_v9  ;;  %v159_v38 = vmul.f32 %v155_v23, %v1035_v10  ;;  %v171_v39 = vmul.f32 %v167_v25, %v163_v24  ;;  %p879_p8 = pnand %p878_p7, %p872_p4 }
  0x55   :  { %v179_v40 = vadd.f32 4.0, %v1035_v10  ;;  %v183_v41 = vadd.f32 5.0, %v1035_v10  ;;  %666 = vlog2.f32 %v1032_v9  ;;  %v1066_v42 = vadd.f32 7.0, %v1035_v10 }
  0x56   :  { %v172_v45 = vmul.f32 %v168_v30, %v156_v26  ;;  %v173_v46 = vmul.f32 %v169_v31, %v157_v27  ;;  %v184_v47 = vmul.f32 %v180_v33, %v176_v29  ;;  %668 = vrcp.f32 %v1037_v11 }
  0x57   :  { %v663_v43 = vpop.eup %662  ;;  %v174_v49 = vmul.f32 %v170_v34, %v158_v28  ;;  %v185_v50 = vmul.f32 %v181_v36, %v177_v32  ;;  %v186_v51 = vmul.f32 %v182_v37, %v178_v35  ;;  %670 = vrcp.f32 %v1045_v19 }
  0x58   :  { %v175_v52 = vmul.f32 %v171_v39, %v159_v38  ;;  %v187_v53 = vmul.f32 %v183_v41, %v179_v40  ;;  %672 = vrcp.f32 %v1050_v22  ;;  %v1077_v55 = vadd.f32 1.0, %v1068_v44 }
  0x59   :  { %v665_v54 = vpop.eup %664  ;;  %674 = vrcp.f32 %v1066_v42  ;;  %v188_v57 = vmul.f32 %v184_v47, %v172_v45  ;;  %v192_v58 = vadd.f32 6.0, %v108_v7  ;;  %v1083_v59 = vadd.f32 1.0, %v1071_v48 }
  0x5a   :  { %676 = vlog2.f32 %v1037_v11  ;;  %v189_v61 = vmul.f32 %v185_v50, %v173_v46  ;;  %v190_v62 = vmul.f32 %v186_v51, %v174_v49  ;;  %v193_v63 = vadd.f32 6.0, %v1029_v8 }
  0x5b   :  { %678 = vlog2.f32 %v1045_v19  ;;  %v191_v0 = vmul.f32 %v187_v53, %v175_v52  ;;  %v194_v1 = vadd.f32 6.0, %v1032_v9  ;;  %v195_v2 = vadd.f32 6.0, %v1035_v10 }
  0x5c   :  { %680 = vlog2.f32 %v1050_v22  ;;  %v1094_v7 = vadd.f32 1.0, %v1079_v56  ;;  %v1098_v12 = vadd.f32 %v1019_v3, %v1068_v44  ;;  %v1102_v8 = vadd.f32 %v1021_v4, %v1071_v48 }
  0x5d   :  { %682 = vlog2.f32 %v1066_v42  ;;  %v1106_v9 = vadd.f32 1.0, %v1085_v60  ;;  %v1110_v13 = vadd.f32 %v1023_v5, %v1079_v56  ;;  %v1114_v14 = vadd.f32 %v1025_v6, %v1085_v60 }
  0x5e   :  { %1575 = vst [vmem:[#allocation23_spill] sm:$0xff] %v1098_v12  ;;  %1576 = vst [vmem:[#allocation24_spill] sm:$0xff] %v1102_v8  ;;  %684 = vlog2.f32 %v1035_v10  ;;  %v1118_v16 = vmul.f32 0.6931472, %v663_v43  ;;  %v1120_v17 = vmul.f32 0.6931472, %v665_v54  ;;  %v196_v18 = vmul.f32 %v192_v58, %v188_v57 }
  0x5f   :  { %1577 = vst [vmem:[#allocation25_spill] sm:$0xff] %v1110_v13  ;;  %1578 = vst [vmem:[#allocation26_spill] sm:$0xff] %v1114_v14  ;;  %v1116_v15 = vpop.eup %666  ;;  %v197_v20 = vmul.f32 %v193_v63, %v189_v61  ;;  %v198_v21 = vmul.f32 %v194_v1, %v190_v62  ;;  %v199_v23 = vmul.f32 %v195_v2, %v191_v0  ;;  %v641_v24 = vadd.f32 -0.5, %v1037_v11 }
  0x60   :  { %1579 = vst [vmem:[#allocation27_spill] sm:$0xff] %v1116_v15  ;;  %1580 = vst [vmem:[#allocation28_spill] sm:$0xff] %v1118_v16  ;;  %v669_v10 = vpop.eup %668  ;;  %v642_v25 = vadd.f32 -0.5, %v1045_v19  ;;  %v643_v27 = vadd.f32 -0.5, %v1050_v22  ;;  %v644_v28 = vadd.f32 -0.5, %v1066_v42  ;;  %v1127_v29 = vadd.f32 7.0, %v1077_v55 }
  0x61   :  { %1581 = vst [vmem:[#allocation29_spill] sm:$0xff] %v1120_v17  ;;  %v671_v26 = vpop.eup %670  ;;  %v272_v30 = vadd.f32 1.0, %v1077_v55  ;;  %v1131_v32 = vadd.f32 7.0, %v1083_v59  ;;  %v273_v33 = vadd.f32 1.0, %v1083_v59  ;;  %v274_v34 = vadd.f32 1.0, %v1094_v7 }
  0x62   :  { %v673_v31 = vpop.eup %672  ;;  %v275_v35 = vadd.f32 1.0, %v1106_v9  ;;  %v1137_v37 = vadd.f32 7.0, %v1094_v7  ;;  %v1140_v38 = vadd.f32 7.0, %v1106_v9  ;;  %v280_v39 = vadd.f32 2.0, %v1077_v55 }
  0x63   :  { %v675_v36 = vpop.eup %674  ;;  %v284_v40 = vadd.f32 3.0, %v1077_v55  ;;  %v281_v43 = vadd.f32 2.0, %v1083_v59  ;;  %v282_v45 = vadd.f32 2.0, %v1094_v7  ;;  %v285_v46 = vadd.f32 3.0, %v1083_v59 }
  0x64   :  { %v677_v41 = vpop.eup %676  ;;  %v286_v47 = vadd.f32 3.0, %v1094_v7  ;;  %686 = vlog2.f32 %v196_v18  ;;  %v276_v50 = vmul.f32 %v272_v30, %v1077_v55  ;;  %v283_v51 = vadd.f32 2.0, %v1106_v9 }
  0x65   :  { %v679_v49 = vpop.eup %678  ;;  %v287_v52 = vadd.f32 3.0, %v1106_v9  ;;  %688 = vlog2.f32 %v197_v20  ;;  %v277_v54 = vmul.f32 %v273_v33, %v1083_v59  ;;  %v278_v57 = vmul.f32 %v274_v34, %v1094_v7 }
  0x66   :  { %v681_v53 = vpop.eup %680  ;;  %v279_v58 = vmul.f32 %v275_v35, %v1106_v9  ;;  %v208_v62 = vmul.f32 %v669_v10, %v669_v10  ;;  %v288_v63 = vmul.f32 %v284_v40, %v280_v39  ;;  %v296_v0 = vadd.f32 4.0, %v1077_v55 }
  0x67   :  { %v683_v61 = vpop.eup %682  ;;  %v297_v1 = vadd.f32 4.0, %v1083_v59  ;;  %v209_v18 = vmul.f32 %v671_v26, %v671_v26  ;;  %v210_v30 = vmul.f32 %v673_v31, %v673_v31  ;;  %v289_v60 = vmul.f32 %v285_v46, %v281_v43 }
  0x68   :  { %v1156_v2 = vpop.eup %684  ;;  %v290_v56 = vmul.f32 %v286_v47, %v282_v45  ;;  %v1158_v20 = vmul.f32 0.083333336, %v669_v10  ;;  %v211_v33 = vmul.f32 %v675_v36, %v675_v36  ;;  %v229_v48 = vmul.f32 0.6931472, %v677_v41 }
  0x69   :  { %1582 = vst [vmem:[#allocation30_spill] sm:$0xff] %v1156_v2  ;;  %v291_v34 = vmul.f32 %v287_v52, %v283_v51  ;;  %v231_v44 = vmul.f32 0.6931472, %v679_v49  ;;  %v233_v35 = vmul.f32 0.6931472, %v681_v53  ;;  %690 = vlog2.f32 %v198_v21 }
  0x6a   :  { %v235_v17 = vmul.f32 0.6931472, %v683_v61  ;;  %v1160_v39 = vmul.f32 0.083333336, %v671_v26  ;;  %v212_v40 = vmul.f32 %v669_v10, %v208_v62  ;;  %692 = vlog2.f32 %v199_v23 }
  0x6b   :  { %v292_v16 = vmul.f32 %v288_v63, %v276_v50  ;;  %v213_v15 = vmul.f32 %v671_v26, %v209_v18  ;;  %v214_v2 = vmul.f32 %v673_v31, %v210_v30  ;;  %v293_v6 = vmul.f32 %v289_v60, %v277_v54 }
  0x6c   :  { %v294_v5 = vmul.f32 %v290_v56, %v278_v57  ;;  %v1162_v43 = vmul.f32 0.083333336, %v673_v31  ;;  %v215_v45 = vmul.f32 %v675_v36, %v211_v33  ;;  %v236_v46 = vmul.f32 %v641_v24, %v229_v48 }
  0x6d   :  { %v295_v47 = vmul.f32 %v291_v34, %v279_v58  ;;  %v1164_v41 = vmul.f32 0.083333336, %v675_v36  ;;  %v237_v49 = vmul.f32 %v642_v25, %v231_v44  ;;  %v238_v51 = vmul.f32 %v643_v27, %v233_v35 }
  0x6e   :  { %v239_v52 = vmul.f32 %v644_v28, %v235_v17  ;;  %v687_v21 = vpop.eup %686  ;;  %v216_v53 = vmul.f32 0.0027777778, %v212_v40  ;;  %v298_v10 = vadd.f32 4.0, %v1094_v7  ;;  %v300_v23 = vadd.f32 5.0, %v1077_v55 }
  0x6f   :  { %v301_v26 = vadd.f32 5.0, %v1083_v59  ;;  %v689_v60 = vpop.eup %688  ;;  %v217_v56 = vmul.f32 0.0027777778, %v213_v15  ;;  %v218_v31 = vmul.f32 0.0027777778, %v214_v2  ;;  %v299_v50 = vadd.f32 4.0, %v1106_v9 }
  0x70   :  { %v302_v48 = vadd.f32 5.0, %v1094_v7  ;;  %v219_v24 = vmul.f32 0.0027777778, %v215_v45  ;;  %v240_v44 = vsub.f32 %v236_v46, %v1037_v11  ;;  %v303_v17 = vadd.f32 5.0, %v1106_v9 }
  0x71   :  { %694 = vrcp.f32 %v1127_v29  ;;  %v241_v25 = vsub.f32 %v237_v49, %v1045_v19  ;;  %v242_v27 = vsub.f32 %v238_v51, %v1050_v22  ;;  %v243_v28 = vsub.f32 %v239_v52, %v1066_v42 }
  0x72   :  { %696 = vrcp.f32 %v1131_v32  ;;  %v220_v15 = vsub.f32 %v1158_v20, %v216_v53  ;;  %v304_v36 = vmul.f32 %v300_v23, %v296_v0  ;;  %v305_v54 = vmul.f32 %v301_v26, %v297_v1 }
  0x73   :  { %698 = vrcp.f32 %v1137_v37  ;;  %v691_v57 = vpop.eup %690  ;;  %v221_v11 = vsub.f32 %v1160_v39, %v217_v56  ;;  %v222_v58 = vsub.f32 %v1162_v43, %v218_v31  ;;  %v306_v61 = vmul.f32 %v302_v48, %v298_v10 }
  0x74   :  { %700 = vrcp.f32 %v1140_v38  ;;  %v693_v19 = vpop.eup %692  ;;  %v244_v22 = vadd.f32 0.9189385, %v240_v44  ;;  %v1183_v62 = vmul.f32 0.6931472, %v687_v21  ;;  %v307_v42 = vmul.f32 %v303_v17, %v299_v50 }
  0x75   :  { %702 = vlog2.f32 %v1127_v29  ;;  %v223_v63 = vsub.f32 %v1164_v41, %v219_v24  ;;  %v245_v0 = vadd.f32 0.9189385, %v241_v25  ;;  %v246_v1 = vadd.f32 0.9189385, %v242_v27 }
  0x76   :  { %v247_v2 = vadd.f32 0.9189385, %v243_v28  ;;  %v308_v18 = vmul.f32 %v304_v36, %v292_v16  ;;  %v309_v30 = vmul.f32 %v305_v54, %v293_v6  ;;  %v312_v20 = vadd.f32 6.0, %v1077_v55 }
  0x77   :  { %704 = vlog2.f32 %v1131_v32  ;;  %v310_v33 = vmul.f32 %v306_v61, %v294_v5  ;;  %v313_v34 = vadd.f32 6.0, %v1083_v59  ;;  %v314_v35 = vadd.f32 6.0, %v1094_v7 }
  0x78   :  { %706 = vlog2.f32 %v1137_v37  ;;  %v1192_v39 = vmul.f32 0.6931472, %v689_v60  ;;  %v311_v40 = vmul.f32 %v307_v42, %v295_v47  ;;  %v315_v43 = vadd.f32 6.0, %v1106_v9 }
  0x79   :  { %708 = vlog2.f32 %v1140_v38  ;;  %v1196_v16 = vadd.f32 %v244_v22, %v220_v15  ;;  %v1198_v6 = vmul.f32 0.6931472, %v691_v57  ;;  %v1200_v55 = vmul.f32 0.6931472, %v693_v19 }
  0x7a   :  { %v1203_v5 = vadd.f32 1e-10, %v1098_v12  ;;  %v1205_v7 = vadd.f32 %v245_v0, %v221_v11  ;;  %v1207_v45 = vadd.f32 %v246_v1, %v222_v58  ;;  %v316_v46 = vmul.f32 %v312_v20, %v308_v18  ;;  %v89_v12 = vld [vmem:[#allocation5 + $0x8] sm:$0xff] }
  0x7b   :  { %v695_v59 = vpop.eup %694  ;;  %v1210_v47 = vadd.f32 1e-10, %v1102_v8  ;;  %v1212_v41 = vadd.f32 %v247_v2, %v223_v63  ;;  %v317_v49 = vmul.f32 %v313_v34, %v309_v30  ;;  %v318_v51 = vmul.f32 %v314_v35, %v310_v33 }
  0x7c   :  { %v697_v9 = vpop.eup %696  ;;  %v645_v52 = vadd.f32 -0.5, %v1127_v29  ;;  %v1215_v53 = vmul.f32 %v315_v43, %v311_v40  ;;  %v646_v10 = vadd.f32 -0.5, %v1131_v32  ;;  %v1219_v23 = vadd.f32 1e-10, %v1110_v13 }
  0x7d   :  { %v699_v21 = vpop.eup %698  ;;  %v1222_v26 = vadd.f32 1e-10, %v1114_v14  ;;  %v647_v56 = vadd.f32 -0.5, %v1137_v37  ;;  %v648_v31 = vadd.f32 -0.5, %v1140_v38  ;;  %v1227_v50 = vadd.f32 7.0, %v1203_v5 }
  0x7e   :  { %v701_v60 = vpop.eup %700  ;;  %v400_v48 = vadd.f32 1.0, %v1203_v5  ;;  %710 = vlog2.f32 %v316_v46  ;;  %v1231_v44 = vadd.f32 7.0, %v1210_v47  ;;  %v401_v17 = vadd.f32 1.0, %v1210_v47 }
  0x7f   :  { %v703_v24 = vpop.eup %702  ;;  %v408_v25 = vadd.f32 2.0, %v1203_v5  ;;  %v328_v27 = vmul.f32 %v695_v59, %v695_v59  ;;  %v329_v28 = vmul.f32 %v697_v9, %v697_v9  ;;  %v330_v15 = vmul.f32 %v699_v21, %v699_v21 }
  0x80   :  { %712 = vlog2.f32 %v317_v49  ;;  %v331_v54 = vmul.f32 %v701_v60, %v701_v60  ;;  %v1236_v57 = vadd.f32 7.0, %v1219_v23  ;;  %v1239_v11 = vadd.f32 7.0, %v1222_v26 }
  0x81   :  { %v705_v36 = vpop.eup %704  ;;  %714 = vlog2.f32 %v318_v51  ;;  %v349_v61 = vmul.f32 0.6931472, %v703_v24  ;;  %v402_v19 = vadd.f32 1.0, %v1219_v23  ;;  %v403_v22 = vadd.f32 1.0, %v1222_v26 }
  0x82   :  { %v707_v58 = vpop.eup %706  ;;  %v404_v42 = vmul.f32 %v400_v48, %v1203_v5  ;;  %v405_v0 = vmul.f32 %v401_v17, %v1210_v47  ;;  %v409_v1 = vadd.f32 2.0, %v1210_v47  ;;  %v410_v2 = vadd.f32 2.0, %v1219_v23 }
  0x83   :  { %v709_v63 = vpop.eup %708  ;;  %v412_v18 = vadd.f32 3.0, %v1203_v5  ;;  %v332_v30 = vmul.f32 %v695_v59, %v328_v27  ;;  %v333_v20 = vmul.f32 %v697_v9, %v329_v28  ;;  %v334_v33 = vmul.f32 %v699_v21, %v330_v15 }
  0x84   :  { %v411_v34 = vadd.f32 2.0, %v1222_v26  ;;  %v335_v35 = vmul.f32 %v701_v60, %v331_v54  ;;  %v351_v40 = vmul.f32 0.6931472, %v705_v36  ;;  %v353_v43 = vmul.f32 0.6931472, %v707_v58 }
  0x85   :  { %v413_v46 = vadd.f32 3.0, %v1210_v47  ;;  %v1250_v49 = vmul.f32 0.083333336, %v695_v59  ;;  %v355_v51 = vmul.f32 0.6931472, %v709_v63  ;;  %v356_v48 = vmul.f32 %v645_v52, %v349_v61 }
  0x86   :  { %v414_v24 = vadd.f32 3.0, %v1219_v23  ;;  %v1253_v17 = vmul.f32 0.083333336, %v697_v9  ;;  %v1255_v14 = vmul.f32 0.083333336, %v699_v21  ;;  %v415_v27 = vadd.f32 3.0, %v1222_v26 }
  0x87   :  { %v416_v28 = vmul.f32 %v412_v18, %v408_v25  ;;  %v1258_v15 = vmul.f32 0.0027777778, %v332_v30  ;;  %v1260_v54 = vmul.f32 0.0027777778, %v333_v20  ;;  %v1262_v36 = vmul.f32 0.0027777778, %v334_v33 }
  0x88   :  { %v406_v59 = vmul.f32 %v402_v19, %v1219_v23  ;;  %v711_v58 = vpop.eup %710  ;;  %v1265_v63 = vmul.f32 0.083333336, %v701_v60  ;;  %v1267_v52 = vmul.f32 0.0027777778, %v335_v35  ;;  %v357_v9 = vmul.f32 %v646_v10, %v351_v40  ;;  %v88_v60 = vld [vmem:[#allocation5] sm:$0xff] }
  0x89   :  { %v358_v61 = vmul.f32 %v647_v56, %v353_v43  ;;  %v1269_v13 = vmul.f32 %v648_v31, %v355_v51  ;;  %v360_v25 = vsub.f32 %v356_v48, %v1127_v29  ;;  %v407_v18 = vmul.f32 %v403_v22, %v1222_v26  ;;  %v1583_v22 = vld [vmem:[#allocation17_spill] sm:$0xff]  ;;  %v1584_v56 = vld [vmem:[#allocation18_spill] sm:$0xff] }
  0x8a   :  { %v713_v21 = vpop.eup %712  ;;  %v417_v30 = vmul.f32 %v413_v46, %v409_v1  ;;  %716 = vlog2.f32 %v1215_v53  ;;  %v418_v33 = vmul.f32 %v414_v24, %v410_v2  ;;  %v419_v19 = vmul.f32 %v415_v27, %v411_v34 }
  0x8b   :  { %v715_v20 = vpop.eup %714  ;;  %v420_v8 = vmul.f32 %v416_v28, %v404_v42  ;;  %v340_v10 = vsub.f32 %v1250_v49, %v1258_v15  ;;  %v1280_v31 = vmul.f32 0.6931472, %v711_v58  ;;  %v361_v53 = vsub.f32 %v357_v9, %v1131_v32  ;;  %v90_v32 = vld [vmem:[#allocation5 + $0x10] sm:$0xff] }
  0x8c   :  { %v362_v42 = vsub.f32 %v358_v61, %v1137_v37  ;;  %v1286_v1 = vmul.f32 0.6931472, %v713_v21  ;;  %v363_v34 = vsub.f32 %v1269_v13, %v1140_v38  ;;  %v364_v35 = vadd.f32 0.9189385, %v360_v25  ;;  %v91_v37 = vld [vmem:[#allocation5 + $0x18] sm:$0xff] }
  0x8d   :  { %v1290_v40 = vmul.f32 0.6931472, %v715_v20  ;;  %v421_v43 = vmul.f32 %v417_v30, %v405_v0  ;;  %v424_v51 = vadd.f32 4.0, %v1203_v5  ;;  %718 = vrcp.f32 %v1227_v50 }
  0x8e   :  { %v425_v48 = vadd.f32 4.0, %v1210_v47  ;;  %v426_v24 = vadd.f32 4.0, %v1219_v23  ;;  %v428_v13 = vadd.f32 5.0, %v1203_v5  ;;  %720 = vrcp.f32 %v1231_v44 }
  0x8f   :  { %v429_v0 = vadd.f32 5.0, %v1210_v47  ;;  %722 = vrcp.f32 %v1236_v57  ;;  %v427_v28 = vadd.f32 4.0, %v1222_v26  ;;  %v430_v15 = vadd.f32 5.0, %v1219_v23 }
  0x90   :  { %v431_v58 = vadd.f32 5.0, %v1222_v26  ;;  %724 = vrcp.f32 %v1239_v11  ;;  %v365_v30 = vadd.f32 0.9189385, %v361_v53  ;;  %v422_v20 = vmul.f32 %v418_v33, %v406_v59 }
  0x91   :  { %726 = vlog2.f32 %v1227_v50  ;;  %v1322_v59 = vadd.f32 %v364_v35, %v340_v10 }
  0x92   :  { %v435_v53 = vmul.f32 %v431_v58, %v427_v28 }
  0xca   :  { %v97_v2 = vpop.permute.xlu0 %96 }
  0xcb   :  { %v1292_v46 = vmul.f32 %v97_v2, %v88_v60  ;;  %v1294_v49 = vmul.f32 %v97_v2, %v89_v12  ;;  %v432_v60 = vmul.f32 %v428_v13, %v424_v51  ;;  %v717_v2 = vpop.eup %716  ;;  %v440_v51 = vadd.f32 6.0, %v1203_v5 }
  0xcc   :  { %v1326_v13 = vpop.eup %718  ;;  %v442_v5 = vadd.f32 6.0, %v1219_v23  ;;  %v1596_v23 = vld [vmem:[#allocation15_spill] sm:$0xff] }
  0xcd   :  { %v120_v38 = vadd.f32 %v1292_v46, %v1019_v3  ;;  %v121_v12 = vadd.f32 %v1294_v49, %v1021_v4  ;;  %v433_v3 = vmul.f32 %v429_v0, %v425_v48  ;;  %v436_v33 = vmul.f32 %v432_v60, %v420_v8 }
  0xce   :  { %v102_v27 = vpop.permute.xlu0 %101  ;;  %v367_v48 = vadd.f32 0.9189385, %v363_v34  ;;  %v137_v60 = vadd.f32 1e-10, %v1294_v49 }
  0xcf   :  { %v1312_v9 = vmul.f32 %v102_v27, %v90_v32  ;;  %v1314_v61 = vmul.f32 %v102_v27, %v91_v37  ;;  %v124_v21 = vadd.f32 1e-10, %v120_v38  ;;  %v125_v25 = vadd.f32 1e-10, %v121_v12 }
  0xd0   :  { %v366_v32 = vadd.f32 0.9189385, %v362_v42  ;;  %v423_v37 = vmul.f32 %v419_v19, %v407_v18  ;;  %v434_v27 = vmul.f32 %v430_v15, %v426_v24  ;;  %v437_v0 = vmul.f32 %v433_v3, %v421_v43  ;;  %v1329_v19 = vpop.eup %720  ;;  %v1588_v43 = vld [vmem:[#allocation30_spill] sm:$0xff] }
  0xd1   :  { %v122_v29 = vadd.f32 %v1312_v9, %v1583_v22  ;;  %v123_v4 = vadd.f32 %v1314_v61, %v1584_v56  ;;  %728 = vlog2.f32 %v124_v21  ;;  %v441_v18 = vadd.f32 6.0, %v1210_v47  ;;  %v1362_v21 = vld [vmem:[#allocation8] sm:$0xff] }
  0xd2   :  { %730 = vlog2.f32 %v125_v25  ;;  %v438_v8 = vmul.f32 %v434_v27, %v422_v20  ;;  %v1586_v42 = vsub.f32 %v1255_v14, %v1262_v36  ;;  %v439_v3 = vmul.f32 %v435_v53, %v423_v37  ;;  %v1373_v27 = vld [vmem:[#allocation8 + $0x8] sm:$0xff] }
  0xd3   :  { %v126_v38 = vadd.f32 1e-10, %v122_v29  ;;  %v127_v12 = vadd.f32 1e-10, %v123_v4  ;;  %732 = vlog2.f32 %v1231_v44  ;;  %v1585_v4 = vsub.f32 %v1253_v17, %v1260_v54  ;;  %v1337_v29 = vpop.eup %722  ;;  %v1587_v17 = vld [vmem:[#allocation27_spill] sm:$0xff] }
  0xd4   :  { %734 = vlog2.f32 %v1236_v57  ;;  %v1342_v34 = vadd.f32 %v366_v32, %v1586_v42  ;;  %v443_v47 = vadd.f32 6.0, %v1222_v26  ;;  %v1346_v35 = vpop.eup %724  ;;  %v1349_v54 = vmul.f32 0.6931472, %v1587_v17 }
  0xd5   :  { %736 = vlog2.f32 %v126_v38  ;;  %v1334_v10 = vadd.f32 %v365_v30, %v1585_v4  ;;  %v1352_v24 = vmul.f32 0.6931472, %v1588_v43  ;;  %v444_v28 = vmul.f32 %v440_v51, %v436_v33  ;;  %v727_v58 = vpop.eup %726  ;;  %v1380_v33 = vld [vmem:[#allocation8 + $0x10] sm:$0xff] }
  0xd6   :  { %738 = vlog2.f32 %v127_v12  ;;  %v445_v15 = vmul.f32 %v441_v18, %v437_v0  ;;  %v1589_v25 = vsub.f32 %v1265_v63, %v1267_v52  ;;  %v1369_v20 = vmul.f32 0.6931472, %v717_v2 }
  0xd7   :  { %740 = vlog2.f32 %v1239_v11  ;;  %v446_v32 = vmul.f32 %v442_v5, %v438_v8  ;;  %v447_v53 = vmul.f32 %v443_v47, %v439_v3  ;;  %v649_v63 = vadd.f32 -0.5, %v1227_v50  ;;  %v1592_v47 = vld [vmem:[#allocation28_spill] sm:$0xff] }
  0xd8   :  { %v1367_v30 = vadd.f32 %v367_v48, %v1589_v25  ;;  %v650_v51 = vadd.f32 -0.5, %v1231_v44  ;;  %v651_v48 = vadd.f32 -0.5, %v1236_v57  ;;  %742 = vlog2.f32 %v444_v28 }
  0xd9   :  { %v652_v4 = vadd.f32 -0.5, %v1239_v11  ;;  %744 = vlog2.f32 %v445_v15  ;;  %v456_v42 = vmul.f32 %v1326_v13, %v1326_v13  ;;  %v1396_v28 = vmul.f32 0.083333336, %v1326_v13  ;;  %v1593_v15 = vld [vmem:[#allocation29_spill] sm:$0xff] }
  0xda   :  { %746 = vlog2.f32 %v446_v32  ;;  %v136_v32 = vadd.f32 1e-10, %v1292_v46  ;;  %v457_v12 = vmul.f32 %v1329_v19, %v1329_v19  ;;  %v477_v26 = vmul.f32 0.6931472, %v727_v58 }
  0xdb   :  { %v729_v37 = vpop.eup %728  ;;  %748 = vlog2.f32 %v447_v53  ;;  %v458_v53 = vmul.f32 %v1337_v29, %v1337_v29  ;;  %v138_v3 = vadd.f32 1e-10, %v1312_v9  ;;  %v460_v46 = vmul.f32 %v1326_v13, %v456_v42  ;;  %v1424_v42 = vld [vmem:[#allocation8 + $0x18] sm:$0xff] }
  0xdc   :  { %v731_v52 = vpop.eup %730  ;;  %v1382_v2 = vmul.f32 0.6931472, %v729_v37  ;;  %750 = vlog2.f32 %v136_v32  ;;  %v484_v9 = vmul.f32 %v649_v63, %v477_v26 }
  0xdd   :  { %v733_v0 = vpop.eup %732  ;;  %v1386_v18 = vmul.f32 0.6931472, %v731_v52  ;;  %752 = vlog2.f32 %v137_v60 }
  0xde   :  { %1590 = vst [vmem:[#allocation17_spill] sm:$0xff] %v1382_v2  ;;  %v735_v5 = vpop.eup %734  ;;  %v560_v17 = vsub.f32 %v1592_v47, %v1382_v2  ;;  %v479_v8 = vmul.f32 0.6931472, %v733_v0  ;;  %v139_v2 = vadd.f32 1e-10, %v1314_v61  ;;  %754 = vlog2.f32 %v138_v3 }
  0xdf   :  { %1591 = vst [vmem:[#allocation18_spill] sm:$0xff] %v1386_v18  ;;  %v737_v43 = vpop.eup %736  ;;  %v561_v37 = vsub.f32 %v1593_v15, %v1386_v18  ;;  %v481_v18 = vmul.f32 0.6931472, %v735_v5 }
  0xe0   :  { %v739_v52 = vpop.eup %738  ;;  %v1401_v36 = vmul.f32 0.6931472, %v737_v43  ;;  %v564_v25 = vmul.f32 %v560_v17, %v1596_v23  ;;  %v459_v43 = vmul.f32 %v1346_v35, %v1346_v35 }
  0xe1   :  { %v741_v38 = vpop.eup %740  ;;  %v1406_v14 = vmul.f32 0.6931472, %v739_v52  ;;  %v1597_v52 = vld [vmem:[#allocation16_spill] sm:$0xff]  ;;  %v486_v63 = vmul.f32 %v651_v48, %v481_v18 }
  0xe2   :  { %1594 = vst [vmem:[#allocation27_spill] sm:$0xff] %v1401_v36  ;;  %v562_v58 = vsub.f32 %v1349_v54, %v1401_v36  ;;  %v565_v15 = vmul.f32 %v561_v37, %v1597_v52  ;;  %v483_v23 = vmul.f32 0.6931472, %v741_v38  ;;  %v568_v0 = vmul.f32 1.442695, %v564_v25  ;;  %v743_v5 = vpop.eup %742 }
  0xe3   :  { %1595 = vst [vmem:[#allocation30_spill] sm:$0xff] %v1406_v14  ;;  %v563_v49 = vsub.f32 %v1352_v24, %v1406_v14  ;;  %v461_v36 = vmul.f32 %v1329_v19, %v457_v12  ;;  %v462_v14 = vmul.f32 %v1337_v29, %v458_v53  ;;  %v485_v37 = vmul.f32 %v650_v51, %v479_v8  ;;  %v745_v52 = vpop.eup %744 }
  0xe4   :  { %v566_v17 = vmul.f32 %v562_v58, %v1583_v22  ;;  %756 = vpow2.f32 %v568_v0  ;;  %v570_v61 = vmul.f32 1.442695, %v565_v15  ;;  %v747_v60 = vpop.eup %746  ;;  %v464_v22 = vmul.f32 0.0027777778, %v460_v46 }
  0xe5   :  { %v567_v13 = vmul.f32 %v563_v49, %v1584_v56  ;;  %758 = vlog2.f32 %v139_v2  ;;  %v488_v56 = vsub.f32 %v484_v9, %v1227_v50  ;;  %v749_v25 = vpop.eup %748  ;;  %v463_v32 = vmul.f32 %v1346_v35, %v459_v43 }
  0xe6   :  { %v572_v38 = vmul.f32 1.442695, %v566_v17  ;;  %v487_v3 = vmul.f32 %v652_v4, %v483_v23  ;;  %v543_v12 = vsub.f32 1.0, %v1424_v42  ;;  %760 = vpow2.f32 %v570_v61 }
  0xe7   :  { %v574_v26 = vmul.f32 1.442695, %v567_v13  ;;  %v453_v51 = vmul.f32 0.083333336, %v1329_v19  ;;  %v1598_v8 = vsub.f32 1.0, %v1362_v21  ;;  %v1599_v53 = vsub.f32 1.0, %v1373_v27  ;;  %v751_v13 = vpop.eup %750 }
  0xe8   :  { %762 = vpow2.f32 %v572_v38  ;;  %v454_v2 = vmul.f32 0.083333336, %v1337_v29  ;;  %v465_v48 = vmul.f32 0.0027777778, %v461_v36  ;;  %v489_v50 = vsub.f32 %v485_v37, %v1231_v44 }
  0xe9   :  { %v544_v15 = vadd.f32 1e-10, %v1598_v8  ;;  %v545_v58 = vadd.f32 1e-10, %v1599_v53  ;;  %764 = vpow2.f32 %v574_v26  ;;  %v466_v18 = vmul.f32 0.0027777778, %v462_v14 }
  0xea   :  { %v468_v4 = vsub.f32 %v1396_v28, %v464_v22  ;;  %v490_v43 = vsub.f32 %v486_v63, %v1236_v57  ;;  %v492_v46 = vadd.f32 0.9189385, %v488_v56  ;;  %v455_v19 = vmul.f32 0.083333336, %v1346_v35  ;;  %v753_v35 = vpop.eup %752 }
  0xeb   :  { %v467_v49 = vmul.f32 0.0027777778, %v463_v32  ;;  %v491_v23 = vsub.f32 %v487_v3, %v1239_v11  ;;  %v1600_v9 = vsub.f32 1.0, %v1380_v33  ;;  %v383_v29 = vsub.f32 %v1367_v30, %v1369_v20 }
  0xec   :  { %v1601_v44 = vsub.f32 %v1196_v16, %v1183_v62  ;;  %v1602_v14 = vsub.f32 %v1322_v59, %v1280_v31  ;;  %v547_v36 = vadd.f32 1e-10, %v543_v12  ;;  %766 = vlog2.f32 %v544_v15  ;;  %v755_v62 = vpop.eup %754 }
  0xed   :  { %v546_v17 = vadd.f32 1e-10, %v1600_v9  ;;  %v1603_v11 = vsub.f32 %v1205_v7, %v1192_v39  ;;  %v1604_v28 = vsub.f32 %v1334_v10, %v1286_v1  ;;  %v469_v30 = vsub.f32 %v453_v51, %v465_v48  ;;  %v1609_v48 = vld [vmem:[#allocation17_spill] sm:$0xff] }
  0xee   :  { %v1452_v57 = vadd.f32 %v1602_v14, %v1601_v44  ;;  %v493_v20 = vadd.f32 0.9189385, %v489_v50  ;;  %768 = vlog2.f32 %v545_v58  ;;  %v470_v16 = vsub.f32 %v454_v2, %v466_v18  ;;  %v757_v61 = vpop.eup %756  ;;  %v1613_v44 = vld [vmem:[#allocation27_spill] sm:$0xff] }
  0xef   :  { %v1460_v0 = vadd.f32 %v1604_v28, %v1603_v11  ;;  %v494_v37 = vadd.f32 0.9189385, %v490_v43  ;;  %v496_v31 = vadd.f32 %v492_v46, %v468_v4  ;;  %v501_v59 = vmul.f32 0.6931472, %v743_v5  ;;  %v759_v26 = vpop.eup %758  ;;  %v1614_v11 = vld [vmem:[#allocation30_spill] sm:$0xff] }
  0xf0   :  { %v1605_v38 = vsub.f32 %v1207_v45, %v1198_v6  ;;  %v1606_v39 = vsub.f32 %v1342_v34, %v1290_v40  ;;  %v471_v1 = vsub.f32 %v455_v19, %v467_v49  ;;  %v495_v10 = vadd.f32 0.9189385, %v491_v23  ;;  %v761_v6 = vpop.eup %760  ;;  %v1611_v49 = vld [vmem:[#allocation29_spill] sm:$0xff]  ;;  %v1612_v23 = vld [vmem:[#allocation18_spill] sm:$0xff] }
  0xf1   :  { %770 = vlog2.f32 %v546_v17  ;;  %v1607_v22 = vsub.f32 %v1212_v41, %v1200_v55  ;;  %v503_v56 = vmul.f32 0.6931472, %v745_v52  ;;  %v1608_v5 = vmov %v1598_v8 }
  0xf2   :  { %v1468_v7 = vadd.f32 %v1606_v39, %v1605_v38  ;;  %772 = vlog2.f32 %v547_v36  ;;  %v576_v32 = vmul.f32 %v757_v61, %v1608_v5  ;;  %v141_v45 = vmul.f32 0.6931472, %v751_v13  ;;  %v763_v51 = vpop.eup %762  ;;  %v1616_v61 = vld [vmem:[#allocation24_spill] sm:$0xff] }
  0xf3   :  { %v1473_v63 = vadd.f32 %v383_v29, %v1607_v22  ;;  %v497_v3 = vadd.f32 %v493_v20, %v469_v30  ;;  %v505_v40 = vmul.f32 0.6931472, %v747_v60  ;;  %v507_v34 = vmul.f32 0.6931472, %v749_v25  ;;  %v765_v41 = vpop.eup %764  ;;  %v1615_v30 = vld [vmem:[#allocation23_spill] sm:$0xff] }
  0xf4   :  { %v498_v8 = vadd.f32 %v494_v37, %v470_v16  ;;  %v508_v15 = vsub.f32 %v496_v31, %v501_v59  ;;  %v577_v58 = vmul.f32 %v761_v6, %v1599_v53  ;;  %v580_v55 = vadd.f32 %v576_v32, %v1362_v21  ;;  %v1618_v32 = vld [vmem:[#allocation25_spill] sm:$0xff] }
  0xf5   :  { %v143_v2 = vmul.f32 0.6931472, %v753_v35  ;;  %v499_v52 = vadd.f32 %v495_v10, %v471_v1  ;;  %v516_v50 = vsub.f32 %v1609_v48, %v1592_v47  ;;  %v1610_v18 = vmov %v1600_v9  ;;  %v1617_v1 = vld [vmem:[#allocation19_spill] sm:$0xff] }
  0xf6   :  { %v578_v4 = vmul.f32 %v763_v51, %v1610_v18  ;;  %v145_v43 = vmul.f32 0.6931472, %v755_v62  ;;  %v579_v60 = vmul.f32 %v765_v41, %v543_v12  ;;  %v581_v25 = vadd.f32 %v577_v58, %v1373_v27  ;;  %v767_v29 = vpop.eup %766  ;;  %v1621_v58 = vld [vmem:[#allocation21_spill] sm:$0xff]  ;;  %v1622_v41 = vld [vmem:[#allocation22_spill] sm:$0xff] }
  0xf7   :  { %v584_v46 = vadd.f32 1e-10, %v580_v55  ;;  %v147_v19 = vmul.f32 0.6931472, %v759_v26  ;;  %v517_v9 = vsub.f32 %v1612_v23, %v1611_v49  ;;  %v524_v17 = vsub.f32 %v1592_v47, %v141_v45  ;;  %v1619_v45 = vld [vmem:[#allocation26_spill] sm:$0xff] }
  0xf8   :  { %v582_v13 = vadd.f32 %v578_v4, %v1380_v33  ;;  %v518_v14 = vsub.f32 %v1613_v44, %v1349_v54  ;;  %v583_v36 = vadd.f32 %v579_v60, %v1424_v42  ;;  %v585_v35 = vadd.f32 1e-10, %v581_v25  ;;  %v769_v12 = vpop.eup %768 }
  0xf9   :  { %774 = vlog2.f32 %v584_v46  ;;  %v519_v28 = vsub.f32 %v1614_v11, %v1352_v24  ;;  %v520_v20 = vmul.f32 %v516_v50, %v1615_v30  ;;  %v525_v62 = vsub.f32 %v1611_v49, %v143_v2  ;;  %v782_v30 = vld [vmem:[#allocation2 + $0x18] sm:$0xff] }
  0xfa   :  { %v586_v16 = vadd.f32 1e-10, %v582_v13  ;;  %v509_v47 = vsub.f32 %v497_v3, %v503_v56  ;;  %v526_v37 = vsub.f32 %v1349_v54, %v145_v43  ;;  %v587_v31 = vadd.f32 1e-10, %v583_v36  ;;  %v1620_v3 = vld [vmem:[#allocation20_spill] sm:$0xff] }
  0xfb   :  { %776 = vlog2.f32 %v585_v35  ;;  %v771_v59 = vpop.eup %770  ;;  %v521_v38 = vmul.f32 %v517_v9, %v1616_v61  ;;  %v527_v39 = vsub.f32 %v1352_v24, %v147_v19  ;;  %v528_v10 = vmul.f32 %v524_v17, %v1617_v1 }
  0xfc   :  { %778 = vlog2.f32 %v586_v16  ;;  %v773_v26 = vpop.eup %772  ;;  %v510_v22 = vsub.f32 %v498_v8, %v505_v40  ;;  %v512_v5 = vsub.f32 %v1452_v57, %v508_v15  ;;  %v522_v6 = vmul.f32 %v518_v14, %v1618_v32 }
  0xfd   :  { %780 = vlog2.f32 %v587_v31  ;;  %v511_v56 = vsub.f32 %v499_v52, %v507_v34  ;;  %v523_v54 = vmul.f32 %v519_v28, %v1619_v45  ;;  %v529_v51 = vmul.f32 %v525_v62, %v1620_v3 }
  0xfe   :  { %v532_v53 = vadd.f32 %v528_v10, %v520_v20  ;;  %v530_v55 = vmul.f32 %v526_v37, %v1621_v58  ;;  %v513_v24 = vsub.f32 %v1460_v0, %v509_v47  ;;  %v531_v2 = vmul.f32 %v527_v39, %v1622_v41 }
  0xff   :  { %v533_v48 = vadd.f32 %v529_v51, %v521_v38  ;;  %v514_v40 = vsub.f32 %v1468_v7, %v510_v22  ;;  %vm600_vm0 = vcmp.le.f32.partialorder %v1617_v1, 1e-08  ;;  %v608_v57 = vmul.f32 %v1362_v21, %v1362_v21 }
 0x100   :  { %v534_v8 = vadd.f32 %v530_v55, %v522_v6  ;;  %v515_v34 = vsub.f32 %v1473_v63, %v511_v56  ;;  %v535_v15 = vadd.f32 %v531_v2, %v523_v54  ;;  %v536_v52 = vadd.f32 %v532_v53, %v512_v5 }
 0x101   :  { %v549_v50 = vmul.f32 0.6931472, %v767_v29  ;;  %vm601_vm1 = vcmp.le.f32.partialorder %v1620_v3, 1e-08  ;;  %vm602_vm2 = vcmp.le.f32.partialorder %v1621_v58, 1e-08  ;;  %v609_v0 = vmul.f32 %v1373_v27, %v1373_v27 }
 0x102   :  { %v610_v7 = vmul.f32 %v1380_v33, %v1380_v33  ;;  %v537_v4 = vadd.f32 %v533_v48, %v513_v24  ;;  %v551_v43 = vmul.f32 0.6931472, %v769_v12  ;;  %v611_v21 = vmul.f32 %v1424_v42, %v1424_v42 }
 0x103   :  { %v775_v18 = vpop.eup %774  ;;  %v538_v25 = vadd.f32 %v534_v8, %v514_v40  ;;  %v553_v46 = vmul.f32 0.6931472, %v771_v59  ;;  %v555_v19 = vmul.f32 0.6931472, %v773_v26  ;;  %v612_v49 = vmul.f32 0.1, %v608_v57 }
 0x104   :  { %v589_v60 = vmul.f32 0.6931472, %v775_v18  ;;  %v539_v9 = vadd.f32 %v535_v15, %v515_v34  ;;  %v556_v17 = vsub.f32 %v536_v52, %v549_v50  ;;  %v613_v14 = vmul.f32 0.1, %v609_v0 }
 0x105   :  { %v777_v63 = vpop.eup %776  ;;  %v614_v33 = vmul.f32 0.1, %v610_v7  ;;  %v557_v36 = vsub.f32 %v537_v4, %v551_v43  ;;  %v558_v11 = vsub.f32 %v538_v25, %v553_v46  ;;  %vm603_vm3 = vcmp.le.f32.partialorder %v782_v30, 1e-08 }
 0x106   :  { %v779_v23 = vpop.eup %778  ;;  %v591_v13 = vmul.f32 0.6931472, %v777_v63  ;;  %v596_v29 = vsub.f32 0.0, %v589_v60  ;;  %v615_v20 = vmul.f32 0.1, %v611_v21  ;;  %v559_v62 = vsub.f32 %v539_v9, %v555_v19 }
 0x107   :  { %v781_v27 = vpop.eup %780  ;;  %v593_v44 = vmul.f32 0.6931472, %v779_v23 }
 0x108   :  { %v595_v35 = vmul.f32 0.6931472, %v781_v27  ;;  %v597_v12 = vsub.f32 0.0, %v591_v13  ;;  %v604_v42 = vsel %vm600_vm0, %v596_v29, %v556_v17 }
 0x109   :  { %v598_v28 = vsub.f32 0.0, %v593_v44  ;;  %v616_v31 = vadd.f32 %v612_v49, %v604_v42 }
 0x10a   :  { %v599_v16 = vsub.f32 0.0, %v595_v35  ;;  %v605_v47 = vsel %vm601_vm1, %v597_v12, %v557_v36 }
 0x10b   :  { %v606_v37 = vsel %vm602_vm2, %v598_v28, %v558_v11  ;;  %v617_v59 = vadd.f32 %v613_v14, %v605_v47 }
 0x10c   :  { %v607_v61 = vsel %vm603_vm3, %v599_v16, %v559_v62  ;;  %v618_v38 = vadd.f32 %v614_v33, %v606_v37 }
 0x10d   :  { %v619_v39 = vadd.f32 %v615_v20, %v607_v61  ;;  %v620_v1 = vadd.f32 %v617_v59, %v616_v31 }
 0x10f   :  { %v621_v10 = vadd.f32 %v619_v39, %v618_v38 }
 0x111   :  { %v622_v26 = vadd.f32 %v621_v10, %v620_v1 }
 0x113   :  { %623 = vst [vmem:[#allocation10] sm:$0xff] %v622_v26 }
 0x114   :  { %882 = shalt.err (!%p879_p8)
}
 0x115   :  { %s883_s22 = scalar_lea.hbm %s1543_s5, 128 }
 0x116   :  { %p884_p9 = scmp.ne.s32.totalorder %s1543_s5, %s883_s22  ;;  %p887_p10 = scmp.lt.u32.totalorder %s883_s22, %s1543_s5 }
 0x118   :  { %p889_p11 = pnand %p887_p10, %p884_p9 }
 0x11a   :  { %892 = shalt.err (!%p889_p11)
}
 0x11b   :  { %633 = dma.vmem_to_hbm [thread:$0]  %s631_s4, 128, %s1543_s5, [#allocation4]  }
 0x11c   :  { %899 = dma.done.wait [#allocation4], 128  }
 0x11d   :  { %900 = vsyncadd [#allocation4], 4294967168 }
 0x11e   :  { %637 = vsyncpa [#allocation3], 1 }
 0x11f   :  { %638 = vsyncpa [#allocation6], 1 }
 0x120   :  { %639 = vsyncpa [#allocation9], 1 }
 0x121   :  { %640 = vsyncpa [#allocation4], 1 }

</bundles_post_ra>
